<compile_context>
chip_gen: v6e
topology: v6e:2x2x1
jax: 0.10.0
libtpu: 0.0.40
codegen_flags: <defaults>
</compile_context>

<pallas_src>
import jax
import jax.numpy as jnp
from jax import lax
from jax.experimental import pallas as pl
from jax.experimental.pallas import tpu as pltpu

HIDDEN = 16


def _round_up(n, m):
    return ((n + m - 1) // m) * m


def simple_nn_kernel(x_ref, w1_ref, b1_ref, w2_ref, b2_ref, o_ref):
    # x_ref : (TILE_B, D) f32   (cast to bf16 in-kernel for the MXU; compute is filler under HBM)
    # w1_ref: (D, 16) f32   b1_ref: (1, 16) f32   w2_ref: (1, 16) f32   b2_ref: (1, 1) f32
    # o_ref : (1, TILE_B) f32   (batch on lanes -> lane-dense stores)
    x_bf = x_ref[...].astype(jnp.bfloat16)
    w1_bf = w1_ref[...].astype(jnp.bfloat16)
    h = jnp.dot(x_bf, w1_bf, preferred_element_type=jnp.float32)        # (TILE_B, 16)
    h = jnp.maximum(h + b1_ref[...], 0.0)                                # bias + ReLU (f32)
    # fc2: contract the hidden dim of both operands -> (1, TILE_B) directly (lane-dense output).
    z = lax.dot_general(
        w2_ref[...], h,
        dimension_numbers=(((1,), (1,)), ((), ())),
        preferred_element_type=jnp.float32,
    )
    o_ref[...] = jax.nn.sigmoid(z + b2_ref[...]).astype(o_ref.dtype)


def _pick_tile_b(B, D, itemsize):
    """Byte-based, 128-aligned batch tile with per-generation VMEM safety margins."""
    TARGET_TILE_BYTES = 4 << 20          # ~4 MiB per x tile -> >=85% of HBM roofline regime
    VMEM_INPUT_BUDGET = 24 << 20         # 2x double-buffered x tiles stay under ~24 MiB (v7x-safe)
    b_pad = _round_up(B, 128)
    bytes_per_row = max(D * itemsize, 1)
    tile = max(TARGET_TILE_BYTES // bytes_per_row, 128)
    cap = max((VMEM_INPUT_BUDGET // 2) // bytes_per_row, 128)
    tile = min(tile, cap)
    tile = _round_up(tile, 128)
    tile = min(tile, b_pad)
    # Megacore (v7x): make sure there are >=2 grid steps when the batch allows it.
    if b_pad >= 256:
        tile = min(tile, _round_up(pl.cdiv(b_pad, 2), 128))
    return max(tile, 128)


def simple_nn_forward(x, w1, b1, w2_row, b2):
    """x: (B, D) f32; w1: (D, 16); b1: (1, 16); w2_row: (1, 16); b2: (1, 1) -> (B, 1) f32."""
    B, D = x.shape
    H = w1.shape[1]

    tile_b = _pick_tile_b(B, D, x.dtype.itemsize)
    grid = (pl.cdiv(B, tile_b),)         # no jnp.pad: Pallas clips the partial last block

    # Explicit VMEM limit sized from the real footprint (with headroom), clamped for v7x's 64 MiB/TC.
    need = (2 * tile_b * D * 4            # double-buffered x tiles (f32)
            + 4 * tile_b * 4              # output tiles (1, tile_b) f32, double-buffered + slack
            + 2 * (D * H + 3 * H + 4) * 4 # resident weights / biases
            + (1 << 20))
    vmem_limit = int(min(max(need, 32 << 20), 48 << 20))

    cost = pl.CostEstimate(
        flops=2 * B * D * H + 4 * B * H,
        transcendentals=B,                                    # sigmoid
        bytes_accessed=B * D * 4 + B * 4 + (D * H + 3 * H + 1) * 4,
    )

    out = pl.pallas_call(
        simple_nn_kernel,
        out_shape=jax.ShapeDtypeStruct((1, B), jnp.float32),
        grid=grid,
        in_specs=[
            pl.BlockSpec((tile_b, D), lambda i: (i, 0)),      # stream x tiles over the grid
            pl.BlockSpec((D, H), lambda i: (0, 0)),           # weights stay VMEM-resident
            pl.BlockSpec((1, H), lambda i: (0, 0)),
            pl.BlockSpec((1, H), lambda i: (0, 0)),
            pl.BlockSpec((1, 1), lambda i: (0, 0)),
        ],
        out_specs=pl.BlockSpec((1, tile_b), lambda i: (0, i)),  # lane-dense output tiles
        compiler_params=pltpu.CompilerParams(
            dimension_semantics=("parallel",),                # shard batch tiles across TCs (v7x)
            vmem_limit_bytes=vmem_limit,
        ),
        cost_estimate=cost,
    )(x, w1, b1, w2_row, b2)

    return out.reshape(B, 1)


def init_params(key, input_size, hidden=HIDDEN):
    # PyTorch-Linear-style U(-1/sqrt(fan_in), 1/sqrt(fan_in)) init; w1 stored (in, out),
    # fc2 stored as a (1, hidden) row so the kernel can contract hidden dims directly.
    k1, k2, k3, k4 = jax.random.split(key, 4)
    bound1 = 1.0 / jnp.sqrt(input_size)
    bound2 = 1.0 / jnp.sqrt(hidden)
    w1 = jax.random.uniform(k1, (input_size, hidden), jnp.float32, -bound1, bound1)
    b1 = jax.random.uniform(k2, (1, hidden), jnp.float32, -bound1, bound1)
    w2_row = jax.random.uniform(k3, (1, hidden), jnp.float32, -bound2, bound2)
    b2 = jax.random.uniform(k4, (1, 1), jnp.float32, -bound2, bound2)
    return w1, b1, w2_row, b2


if __name__ == "__main__":
    key = jax.random.PRNGKey(0)
    kx, kp = jax.random.split(key)

    batch, input_size = 200, 32                     # small demo; batch not tile-aligned (tail block)
    x = jax.random.normal(kx, (batch, input_size), jnp.float32)
    w1, b1, w2_row, b2 = init_params(kp, input_size)

    out = simple_nn_forward(x, w1, b1, w2_row, b2)  # tile_b=128 -> 2 grid steps, clipped tail
    jax.block_until_ready(out)
    assert out.shape == (batch, 1)

    # bf16-matched reference (same in-kernel bf16 fc1 path) -> tight tolerance.
    h_bf = jnp.maximum(
        jnp.dot(x.astype(jnp.bfloat16), w1.astype(jnp.bfloat16),
                preferred_element_type=jnp.float32) + b1, 0.0)
    ref_bf16 = jax.nn.sigmoid(jnp.sum(h_bf * w2_row, axis=-1, keepdims=True) + b2)
    # full-f32 reference -> looser tolerance (kernel does fc1 on the MXU in bf16).
    ref_f32 = jax.nn.sigmoid(jnp.maximum(x @ w1 + b1, 0.0) @ w2_row.T + b2)

    assert jnp.allclose(out, ref_bf16, atol=1e-2), "mismatch vs bf16-matched reference"
    assert jnp.allclose(out, ref_f32, atol=5e-2), "mismatch vs f32 reference"

    print("KERNEL_OK")
</pallas_src>

<mosaic_0001>
module attributes {stable_mosaic.version = 11 : i64} {
  func.func @simple_nn_kernel(%arg0: i32, %arg1: memref<128x32xf32, #tpu.memory_space<vmem>>, %arg2: memref<32x16xf32, #tpu.memory_space<vmem>>, %arg3: memref<1x16xf32, #tpu.memory_space<vmem>>, %arg4: memref<1x16xf32, #tpu.memory_space<vmem>>, %arg5: memref<1x1xf32, #tpu.memory_space<vmem>>, %arg6: memref<1x128xf32, #tpu.memory_space<vmem>>) attributes {dimension_semantics = [#tpu.dimension_semantics<parallel>], iteration_bounds = array<i64: 2>, scalar_prefetch = 0 : i64, scratch_operands = 0 : i64, tpu.core_type = #tpu.core_type<tc>, window_params = [{transform_indices = @transform_0, window_bounds = array<i64: 128, 32>}, {pipeline_mode = #tpu.pipeline_mode<synchronous>, transform_indices = @transform_1, window_bounds = array<i64: 32, 16>}, {pipeline_mode = #tpu.pipeline_mode<synchronous>, transform_indices = @transform_2, window_bounds = array<i64: 1, 16>}, {pipeline_mode = #tpu.pipeline_mode<synchronous>, transform_indices = @transform_3, window_bounds = array<i64: 1, 16>}, {pipeline_mode = #tpu.pipeline_mode<synchronous>, transform_indices = @transform_4, window_bounds = array<i64: 1, 1>}, {transform_indices = @transform_5, window_bounds = array<i64: 1, 128>}]} {
    %c0 = arith.constant 0 : index
    %c0_0 = arith.constant 0 : index
    %0 = vector.load %arg1[%c0, %c0_0] : memref<128x32xf32, #tpu.memory_space<vmem>>, vector<128x32xf32>
    %1 = arith.truncf %0 : vector<128x32xf32> to vector<128x32xbf16>
    %c0_1 = arith.constant 0 : index
    %c0_2 = arith.constant 0 : index
    %2 = vector.load %arg2[%c0_1, %c0_2] : memref<32x16xf32, #tpu.memory_space<vmem>>, vector<32x16xf32>
    %3 = arith.truncf %2 : vector<32x16xf32> to vector<32x16xbf16>
    %cst = arith.constant dense<0.000000e+00> : vector<128x16xf32>
    %4 = tpu.matmul %1, %3, %cst {dimension_numbers = #tpu.dot_dimension_numbers<[1], [0], [0], [1], [0, 0, 1, 1], [], []>} : vector<128x32xbf16>, vector<32x16xbf16>, vector<128x16xf32> -> vector<128x16xf32>
    %c0_3 = arith.constant 0 : index
    %c0_4 = arith.constant 0 : index
    %5 = vector.load %arg3[%c0_3, %c0_4] : memref<1x16xf32, #tpu.memory_space<vmem>>, vector<1x16xf32>
    %6 = vector.broadcast %5 : vector<1x16xf32> to vector<128x16xf32>
    %7 = arith.addf %4, %6 : vector<128x16xf32>
    %cst_5 = arith.constant 0.000000e+00 : f32
    %8 = vector.broadcast %cst_5 : f32 to vector<128x16xf32>
    %9 = arith.maximumf %7, %8 : vector<128x16xf32>
    %c0_6 = arith.constant 0 : index
    %c0_7 = arith.constant 0 : index
    %10 = vector.load %arg4[%c0_6, %c0_7] : memref<1x16xf32, #tpu.memory_space<vmem>>, vector<1x16xf32>
    %cst_8 = arith.constant dense<0.000000e+00> : vector<1x128xf32>
    %11 = tpu.matmul %10, %9, %cst_8 {dimension_numbers = #tpu.dot_dimension_numbers<[1], [1], [0], [0], [0, 0, 1, 0], [], []>} : vector<1x16xf32>, vector<128x16xf32>, vector<1x128xf32> -> vector<1x128xf32>
    %c0_9 = arith.constant 0 : index
    %c0_10 = arith.constant 0 : index
    %12 = vector.load %arg5[%c0_9, %c0_10] : memref<1x1xf32, #tpu.memory_space<vmem>>, vector<1x1xf32>
    %13 = vector.broadcast %12 : vector<1x1xf32> to vector<1x128xf32>
    %14 = arith.addf %11, %13 : vector<1x128xf32>
    %15 = arith.negf %14 : vector<1x128xf32>
    %16 = math.exp %15 : vector<1x128xf32>
    %cst_11 = arith.constant 1.000000e+00 : f32
    %17 = vector.broadcast %cst_11 : f32 to vector<1x128xf32>
    %18 = arith.addf %17, %16 : vector<1x128xf32>
    %19 = arith.divf %17, %18 : vector<1x128xf32>
    %c0_12 = arith.constant 0 : index
    %c0_13 = arith.constant 0 : index
    %20 = vector.load %arg6[%c0_12, %c0_13] : memref<1x128xf32, #tpu.memory_space<vmem>>, vector<1x128xf32>
    tpu.vector_store %arg6[%c0_12, %c0_13], %19 {strides = array<i32>} : memref<1x128xf32, #tpu.memory_space<vmem>>, vector<1x128xf32>,
    return
  }
  func.func @transform_0(%arg0: i32) -> (i32, i32) {
    %c0_i32 = arith.constant 0 : i32
    %c0_i32_0 = arith.constant 0 : i32
    return %arg0, %c0_i32 : i32, i32
  }
  func.func @transform_1(%arg0: i32) -> (i32, i32) {
    %c0_i32 = arith.constant 0 : i32
    %c0_i32_0 = arith.constant 0 : i32
    %c0_i32_1 = arith.constant 0 : i32
    return %c0_i32, %c0_i32_0 : i32, i32
  }
  func.func @transform_2(%arg0: i32) -> (i32, i32) {
    %c0_i32 = arith.constant 0 : i32
    %c0_i32_0 = arith.constant 0 : i32
    %c0_i32_1 = arith.constant 0 : i32
    return %c0_i32, %c0_i32_0 : i32, i32
  }
  func.func @transform_3(%arg0: i32) -> (i32, i32) {
    %c0_i32 = arith.constant 0 : i32
    %c0_i32_0 = arith.constant 0 : i32
    %c0_i32_1 = arith.constant 0 : i32
    return %c0_i32, %c0_i32_0 : i32, i32
  }
  func.func @transform_4(%arg0: i32) -> (i32, i32) {
    %c0_i32 = arith.constant 0 : i32
    %c0_i32_0 = arith.constant 0 : i32
    %c0_i32_1 = arith.constant 0 : i32
    return %c0_i32, %c0_i32_0 : i32, i32
  }
  func.func @transform_5(%arg0: i32) -> (i32, i32) {
    %c0_i32 = arith.constant 0 : i32
    %c0_i32_0 = arith.constant 0 : i32
    return %c0_i32, %arg0 : i32, i32
  }
}

</mosaic_0001>

<bundles_post_ra>
// kernel: tpu_custom_call.1
= control target key start
LH: loop header
LB: loop body
LE: loop exit
PB: predicated region body
PF: predicated region fallthrough
CT: control target
= control target key end

     0   :  { %s1073_s0 = inlined_call_operand.vmem [shape: f32[200,32], index: 0, kind: input, shape index: {}]   ;;  %s1074_s1 = inlined_call_operand.vmem [shape: f32[32,16], index: 1, kind: input, shape index: {}]   ;;  %s1075_s2 = inlined_call_operand.vmem [shape: f32[1,16], index: 2, kind: input, shape index: {}]   ;;  %s1076_s3 = inlined_call_operand.vmem [shape: f32[1,16], index: 3, kind: input, shape index: {}]   ;;  %s1077_s4 = inlined_call_operand.<no memory space> [shape: f32[1,1], index: 4, kind: input, shape index: {}]   ;;  %s1078_s5 = inlined_call_operand.hbm [shape: f32[1,200], index: 5, kind: output, shape index: {}]  }
   0x1   :  { %v10_v0 = vstv %s1077_s4 }
   0x2   :  { %11 = vst [vmem:[#allocation2] sm:$0x1] %v10_v0 }
   0x3   :  { %12 = vsyncpa [#allocation4], 0 }
   0x4   :  { %14 = vsyncpa [#allocation4 + $0x1], 0  ;;  %s894_s20 = smov 0   ;;  %s896_s21 = smov 0  }
   0x5   :  { %s898_s22 = smov 0   ;;  %s900_s23 = smov 0  }
   0x6 LB: > { %s629_s4 = sadd.s32 4294967295, %s855_s23   ;;  %s630_s24 = sadd.s32 4294967294, %s855_s23   ;;  %s855_s23 = sphi %s900_s23, %s1084_s23   ;;  %s851_s22 = sphi %s898_s22, %s1083_s22   ;;  %s847_s21 = sphi %s896_s21, %s1082_s21   ;;  %s843_s20 = sphi %s894_s20, %s1081_s20  }
   0x7   : > { %s917_s25 = sadd.s32 1, %s855_s23   ;;  %s137_s26 = sadd.s32 1, %s851_s22 }
   0x8   : > { %s134_s27 = ssub.s32 %s855_s23, %s917_s25  ;;  %p147_p0 = scmp.ne.s32.totalorder %s851_s22, %s847_s21 }
   0x9   : > { %p135_p1 = scmp.eq.s32.totalorder %s134_s27, 0  ;;  %p148_p2 = scmp.eq.s32.totalorder %s629_s4, 1 }
   0xa   : > { %p153_p3 = scmp.ne.s32.totalorder %s847_s21, %s843_s20  ;;  %p154_p4 = scmp.eq.s32.totalorder %s630_s24, 1 }
   0xb   : > { %s927_s28 = scalar_select %p135_p1, %s851_s22, %s137_s26  }
   0xc   : > { %p929_p5 = por %p148_p2, %p147_p0  ;;  %p933_p6 = por %p154_p4, %p153_p3 }
   0xd   : > { %p633_p7 = scmp.ge.s32.totalorder %s855_s23, 1  ;;  %p201_p8 = scmp.lt.s32.totalorder %s855_s23, 3 }
   0xf   : > { %p202_p9 = pnand %p633_p7, %p201_p8 }
  0x10   : > { %s948_s12 = sshll.u32 (!%p202_p9), %s629_s4, 4  ;;  %s230_s6 = sand.u32 (!%p202_p9), 1, %s847_s21  }
  0x11   : > { %205 = sbr.rel (%p202_p9) target bundleno = 561 (0x231), region = 40  ;;  %p237_p10 = scmp.lt.s32.totalorder (!%p202_p9), %s948_s12, 24 }
  0x12   : > { %s231_s7 = scalar_lea.vmem (!%p202_p9), [#allocation3], %s230_s6  ;;  %s1038_s11 = scalar_lea.hbm (!%p202_p9), %s1078_s5, %s948_s12 }
  0x13   : > { %s575_s8 = sshll.u32 (!%p202_p9), %s231_s7, 4  ;;  %s563_s13 = scalar_lea.sflag (!%p202_p9), [#allocation4], %s230_s6  ;;  %s576_s8 = int_to_ptr.vmem [resolvable:$true] %s575_s8 }
  0x14   : > { %s795_s14 = scalar_lea.vmem (!%p202_p9), %s576_s8, 16 }
  0x15   : > { %p796_p11 = scmp.ne.s32.totalorder (!%p202_p9), %s576_s8, %s795_s14 }
  0x16   : > { %v273_v1 = vld [vmem:[%s1074_s1 + $0x10] sm:$0xff]  ;;  %v274_v2 = vld [vmem:[%s1074_s1 + $0x18] sm:$0xff]  ;;  %v271_v3 = vld [vmem:[%s1074_s1] sm:$0xff]  ;;  %s238_s15 = scalar_select %p237_p10, %s948_s12, 24  ;;  %vm284_vm0 = vcmask 261120   ;;  %v857_v31 = vmov 0.0  }
  0x17   : > { %v276_v4 = vpack.c.bf16 %v274_v2, %v273_v1  ;;  %v272_v5 = vld [vmem:[%s1074_s1 + $0x8] sm:$0xff]  ;;  %713 = vmatprep.subr.mxu1 %v857_v31  ;;  %vm858_vm1 = vmmov 0   ;;  %v423_v32 = vld [vmem:[#allocation2] sm:$0x1]  ;;  %v859_v33 = vmov 0   ;;  %vm433_vm2 = vcmask 130048   ;;  %p797_p12 = pnand %p796_p11, %p929_p5 }
  0x18   : > { %v275_v6 = vpack.c.bf16 %v272_v5, %v271_v3  ;;  %s635_s16 = sshll.u32 %s238_s15, 3  ;;  %745 = vmatprep.mubr.msk.f32.mxu1 %vm858_vm1, %v857_v31  ;;  %790 = vset.pattern.permute.xlu0 %v859_v33  ;;  %v636_v48 = vld [vmem:[%s1075_s2] ss:$0 sm:$0xff]  ;;  %s860_s15 = smov [#allocation3]  }
  0x19   : > { %693 = vmatprep.subr.bf16.mxu0 %v276_v4  ;;  %s958_s19 = scalar_lea.vmem %s1073_s0, %s635_s16  ;;  %426 = vperm.xlu0 %790, %v423_v32   ;;  %p798_p13 = pneg %p797_p12 }
  0x1a   : > { %694 = vmatpush3.bf16.msra.mxu0 %v276_v4  ;;  %v247_v7 = vld [vmem:[%s958_s19] sm:$0xff]  ;;  %v248_v8 = vld [vmem:[%s958_s19 + $0x8] sm:$0xff]  ;;  %v249_v9 = vld [vmem:[%s958_s19 + $0x10] sm:$0xff]  ;;  %s799_s16 = sshll.u32 %s860_s15, 4  ;;  %s800_s16 = int_to_ptr.vmem [resolvable:$false] %s799_s16 }
  0x1b   : > { %695 = vmatprep.subr.bf16.mxu0 %v275_v6  ;;  %v263_v10 = vpack.c.bf16 %v248_v8, %v247_v7  ;;  %v250_v11 = vld [vmem:[%s958_s19 + $0x18] sm:$0xff]  ;;  %v251_v12 = vld [vmem:[%s958_s19 + $0x20] sm:$0xff]  ;;  %v252_v13 = vld [vmem:[%s958_s19 + $0x28] sm:$0xff]  ;;  %s801_s17 = scalar_lea.vmem %s800_s16, 32  ;;  %p802_p0 = scmp.lt.s32.totalorder %s576_s8, %s800_s16 }
  0x1c   : > { %v264_v14 = vpack.c.bf16 %v250_v11, %v249_v9  ;;  %v265_v15 = vpack.c.bf16 %v252_v13, %v251_v12  ;;  %v253_v16 = vld [vmem:[%s958_s19 + $0x30] sm:$0xff]  ;;  %v254_v17 = vld [vmem:[%s958_s19 + $0x38] sm:$0xff]  ;;  %v255_v18 = vld [vmem:[%s958_s19 + $0x40] sm:$0xff]  ;;  %p803_p1 = scmp.lt.s32.totalorder %s801_s17, %s795_s14 }
  0x1d   : > { %697 = vmatprep.mubr.msk.bf16.mxu0 %vm284_vm0, %v263_v10  ;;  %v256_v19 = vld [vmem:[%s958_s19 + $0x48] sm:$0xff]  ;;  %v266_v20 = vpack.c.bf16 %v254_v17, %v253_v16  ;;  %v257_v22 = vld [vmem:[%s958_s19 + $0x50] sm:$0xff]  ;;  %v258_v23 = vld [vmem:[%s958_s19 + $0x58] sm:$0xff] }
  0x1e   : > { %696 = vmatpush3.bf16.msra.mxu0 %v275_v6  ;;  %v267_v21 = vpack.c.bf16 %v256_v19, %v255_v18  ;;  %v259_v24 = vld [vmem:[%s958_s19 + $0x60] sm:$0xff]  ;;  %v260_v25 = vld [vmem:[%s958_s19 + $0x68] sm:$0xff]  ;;  %v268_v26 = vpack.c.bf16 %v258_v23, %v257_v22  ;;  %v261_v28 = vld [vmem:[%s958_s19 + $0x70] sm:$0xff]  ;;  %p804_p2 = por %p803_p1, %p802_p0 }
  0x1f   : > { %v269_v27 = vpack.c.bf16 %v260_v25, %v259_v24  ;;  %v262_v29 = vld [vmem:[%s958_s19 + $0x78] sm:$0xff]  ;;  %v422_v19 = vld [vmem:[%s1076_s3] sm:$0x1] }
  0x20   : > { %v270_v30 = vpack.c.bf16 %v262_v29, %v261_v28  ;;  %p805_p3 = pnand %p804_p2, %p798_p13 }
  0x21   : > { %698 = vmatmul.mubr.msk.bf16.vlgmr.msra.gmra.mxu0 %vm284_vm0, %v264_v14 }
  0x22   : > { %701 = vmatprep.mubr.msk.bf16.mxu0 %vm284_vm0, %v265_v15 }
  0x29   : > { %702 = vmatmul.mubr.msk.bf16.gmra.mxu0 %vm284_vm0, %v266_v20  ;;  %v429_v20 = vlaneseq }
  0x2a   : > { %705 = vmatprep.mubr.msk.bf16.mxu0 %vm284_vm0, %v267_v21 }
  0x2b   : > { %v430_v21 = vshrl.u32 %v429_v20, 7 }
  0x2d   : > { %v431_v22 = vsub.s32 0, %v430_v21 }
  0x31   : > { %706 = vmatmul.mubr.msk.bf16.gmra.mxu0 %vm284_vm0, %v268_v26 }
  0x32   : > { %709 = vmatprep.mubr.msk.bf16.mxu0 %vm284_vm0, %v269_v27 }
  0x39   : > { %710 = vmatmul.mubr.msk.bf16.gmra.mxu0 %vm284_vm0, %v270_v30 }
  0x94   : > { %v427_v23 = vpop.permute.xlu0 %426 }
  0x95   : > { %v432_v24 = vrot.slane %v427_v23, %v431_v22 }
  0xe1   : > { %v986_v34 = vpop.f32.mrf.mxu0 }
  0xe2   : > { %v352_v12 = vadd.f32 %v986_v34, %v636_v48 }
  0xe3   : > { %v988_v35 = vpop.f32.mrf.mxu0 }
  0xe4   : > { %v408_v14 = vmax.f32 %v352_v12, 0.0  ;;  %v344_v16 = vadd.f32 %v636_v48, %v988_v35 }
  0xe5   : > { %v700_v36 = vpop.f32.mrf.mxu0 }
  0xe6   : > { %v355_v10 = vadd.f32 %v700_v36, %v636_v48  ;;  %v406_v18 = vmax.f32 %v344_v16, 0.0 }
  0xe7   : > { %v990_v37 = vpop.f32.mrf.mxu0 }
  0xe8   : > { %v409_v13 = vmax.f32 %v355_v10, 0.0  ;;  %v347_v15 = vadd.f32 %v636_v48, %v990_v37 }
  0xe9   : > { %v703_v38 = vpop.f32.mrf.mxu0 }
  0xea   : > { %v368_v4 = vadd.f32 %v703_v38, %v636_v48  ;;  %v407_v17 = vmax.f32 %v347_v15, 0.0 }
  0xeb   : > { %v359_v39 = vpop.f32.mrf.mxu0 }
  0xec   : > { %v412_v6 = vmax.f32 %v368_v4, 0.0  ;;  %v360_v8 = vadd.f32 %v636_v48, %v359_v39 }
  0xed   : > { %v704_v40 = vpop.f32.mrf.mxu0 }
  0xee   : > { %v371_v2 = vadd.f32 %v704_v40, %v636_v48  ;;  %v410_v11 = vmax.f32 %v360_v8, 0.0 }
  0xef   : > { %v362_v41 = vpop.f32.mrf.mxu0 }
  0xf0   : > { %v413_v5 = vmax.f32 %v371_v2, 0.0  ;;  %v363_v7 = vadd.f32 %v636_v48, %v362_v41 }
  0xf1   : > { %v707_v42 = vpop.f32.mrf.mxu0 }
  0xf2   : > { %v384_v60 = vadd.f32 %v707_v42, %v636_v48  ;;  %v411_v9 = vmax.f32 %v363_v7, 0.0 }
  0xf3   : > { %v375_v43 = vpop.f32.mrf.mxu0 }
  0xf4   : > { %v416_v62 = vmax.f32 %v384_v60, 0.0  ;;  %v376_v0 = vadd.f32 %v636_v48, %v375_v43 }
  0xf5   : > { %v708_v44 = vpop.f32.mrf.mxu0 }
  0xf6   : > { %v387_v58 = vadd.f32 %v708_v44, %v636_v48  ;;  %v414_v3 = vmax.f32 %v376_v0, 0.0 }
  0xf7   : > { %v378_v45 = vpop.f32.mrf.mxu0 }
  0xf8   : > { %v417_v61 = vmax.f32 %v387_v58, 0.0  ;;  %v379_v63 = vadd.f32 %v636_v48, %v378_v45 }
  0xf9   : > { %v711_v46 = vpop.f32.mrf.mxu0 }
  0xfa   : > { %v400_v51 = vadd.f32 %v711_v46, %v636_v48  ;;  %v415_v1 = vmax.f32 %v379_v63, 0.0 }
  0xfb   : > { %v391_v47 = vpop.f32.mrf.mxu0 }
  0xfc   : > { %v420_v54 = vmax.f32 %v400_v51, 0.0  ;;  %v392_v56 = vadd.f32 %v636_v48, %v391_v47 }
  0xfd   : > { %v712_v49 = vpop.f32.mrf.mxu0 }
  0xfe   : > { %v403_v50 = vadd.f32 %v712_v49, %v636_v48  ;;  %v418_v59 = vmax.f32 %v392_v56, 0.0 }
  0xff   : > { %v394_v53 = vpop.f32.mrf.mxu0 }
 0x100   : > { %v421_v52 = vmax.f32 %v403_v50, 0.0  ;;  %v395_v55 = vadd.f32 %v636_v48, %v394_v53 }
 0x102   : > { %714 = vmatpush3.xpose.msk.msra.mxu1 %vm433_vm2, %v421_v52  ;;  %v419_v57 = vmax.f32 %v395_v55, 0.0 }
 0x103   : > { %715 = vmatprep.subr.mxu1 %v857_v31 }
 0x106   : > { %716 = vmatpush3.xpose.msk.msra.mxu1 %vm433_vm2, %v420_v54 }
 0x107   : > { %717 = vmatprep.subr.mxu1 %v857_v31 }
 0x10a   : > { %718 = vmatpush3.xpose.msk.msra.mxu1 %vm433_vm2, %v419_v57 }
 0x10b   : > { %719 = vmatprep.subr.mxu1 %v857_v31 }
 0x10e   : > { %720 = vmatpush3.xpose.msk.msra.mxu1 %vm433_vm2, %v418_v59 }
 0x10f   : > { %721 = vmatprep.subr.mxu1 %v857_v31 }
 0x112   : > { %722 = vmatpush3.xpose.msk.msra.mxu1 %vm433_vm2, %v417_v61 }
 0x113   : > { %723 = vmatprep.subr.mxu1 %v857_v31 }
 0x116   : > { %724 = vmatpush3.xpose.msk.msra.mxu1 %vm433_vm2, %v416_v62 }
 0x117   : > { %725 = vmatprep.subr.mxu1 %v857_v31 }
 0x11a   : > { %726 = vmatpush3.xpose.msk.msra.mxu1 %vm433_vm2, %v415_v1 }
 0x11b   : > { %727 = vmatprep.subr.mxu1 %v857_v31 }
 0x11e   : > { %728 = vmatpush3.xpose.msk.msra.mxu1 %vm433_vm2, %v414_v3 }
 0x11f   : > { %729 = vmatprep.subr.mxu1 %v857_v31 }
 0x122   : > { %730 = vmatpush3.xpose.msk.msra.mxu1 %vm433_vm2, %v413_v5 }
 0x123   : > { %731 = vmatprep.subr.mxu1 %v857_v31 }
 0x126   : > { %732 = vmatpush3.xpose.msk.msra.mxu1 %vm433_vm2, %v412_v6 }
 0x127   : > { %733 = vmatprep.subr.mxu1 %v857_v31 }
 0x12a   : > { %734 = vmatpush3.xpose.msk.msra.mxu1 %vm433_vm2, %v411_v9 }
 0x12b   : > { %735 = vmatprep.subr.mxu1 %v857_v31 }
 0x12e   : > { %736 = vmatpush3.xpose.msk.msra.mxu1 %vm433_vm2, %v410_v11 }
 0x12f   : > { %737 = vmatprep.subr.mxu1 %v857_v31 }
 0x132   : > { %738 = vmatpush3.xpose.msk.msra.mxu1 %vm433_vm2, %v409_v13 }
 0x133   : > { %739 = vmatprep.subr.mxu1 %v857_v31 }
 0x136   : > { %740 = vmatpush3.xpose.msk.msra.mxu1 %vm433_vm2, %v408_v14 }
 0x137   : > { %741 = vmatprep.subr.mxu1 %v857_v31 }
 0x13a   : > { %742 = vmatpush3.xpose.msk.msra.mxu1 %vm433_vm2, %v407_v17 }
 0x13b   : > { %743 = vmatprep.subr.mxu1 %v857_v31 }
 0x13e   : > { %744 = vmatpush3.xpose.msk.msra.mxu1 %vm433_vm2, %v406_v18 }
 0x141   : > { %746 = vmatmul.mubr.msk.f32.vlgmr.msra.gmra.mxu1 %vm433_vm2, %v422_v19 }
 0x201   : > { %v551_v25 = vpop.f32.mrf.mxu1 }
 0x202   : > { %v552_v26 = vadd.f32 %v551_v25, %v432_v24 }
 0x203   : > { %v747_v27 = vpop.f32.mrf.mxu1 }
 0x204   : > { %v662_v28 = vmul.f32 -1.442695, %v552_v26 }
 0x206   : > { %791 = vpow2.f32 %v662_v28 }
 0x213   : > { %v792_v29 = vpop.eup %791 }
 0x214   : > { %v558_v30 = vadd.f32 1.0, %v792_v29 }
 0x216   : > { %793 = vrcp.f32 %v558_v30 }
 0x223   : > { %v794_v31 = vpop.eup %793 }
 0x224   : > { %561 = vst [vmem:[%s231_s7] sm:$0x1] %v794_v31 }
 0x225   : > { %808 = shalt.err (!%p805_p3)
}
 0x226   : > { %s809_s12 = scalar_lea.hbm %s1038_s11, 16  ;;  %s813_s4 = scalar_lea.hbm %s1078_s5, 32 }
 0x227   : > { %p810_p4 = scmp.ne.s32.totalorder %s1038_s11, %s809_s12  ;;  %p814_p9 = scmp.lt.s32.totalorder %s1038_s11, %s1078_s5 }
 0x228   : > { %p815_p10 = scmp.lt.s32.totalorder %s813_s4, %s809_s12 }
 0x229   : > { %p811_p7 = pnand %p810_p4, %p929_p5 }
 0x22a   : > { %p816_p11 = por %p815_p10, %p814_p9 }
 0x22b   : > { %p812_p8 = pneg %p811_p7 }
 0x22d   : > { %p817_p12 = pnand %p816_p11, %p812_p8 }
 0x22f   : > { %820 = shalt.err (!%p817_p12)
}
 0x230   : > { %748 = dma.vmem_to_hbm [thread:$0]  (%p929_p5), %s576_s8, 16, %s1038_s11, %s563_s13  }
 0x231 PF: > { %p754_p13 = scmp.ge.s32.totalorder %s855_s23, 2  ;;  %s587_s27 = sand.u32 1, %s843_s20  }
 0x232   : > { %s588_s6 = scalar_lea.sflag [#allocation4], %s587_s27 }
 0x233   : > { %p751_p0 = pnand %p754_p13, %p933_p6 }
 0x235   : > { %p752_p1 = pneg %p751_p0 }
 0x237   : > { %838 = dma.done.wait (%p752_p1), %s588_s6, 16  }
 0x238   : > { %840 = vsyncadd (%p752_p1), %s588_s6, 4294967280  ;;  %p17_p2 = scmp.ge.s32.totalorder %s917_s25, 4   ;;  %s1081_s20 = smov %s847_s21 }
 0x239   : > { %s1082_s21 = smov %s851_s22  ;;  %s1083_s22 = smov %s927_s28 }
 0x23a   : > { %s1084_s23 = smov %s917_s25  ;;  %19 = sbr.rel (!%p17_p2) target bundleno = 6 (0x6), region = 75 }
 0x23f   :  { %592 = vsyncpa [#allocation4], 1 }
 0x240   :  { %594 = vsyncpa [#allocation4 + $0x1], 1 }

</bundles_post_ra>
